<compile_context>
chip_gen: v7x
topology: tpu7x:2x2x1
jax: 0.10.0
libtpu: 0.0.40
codegen_flags: <defaults>
</compile_context>

<pallas_src>
import jax
import jax.numpy as jnp
from jax.experimental import pallas as pl
from jax.experimental.pallas import tpu as pltpu

IN_FEATURES = 1712
HIDDEN = 128
OUT_FEATURES = 2
N_PAD = 8          # narrow lane pad for the 2-wide logits; wrapper slices [:, :2]


def _round_up(n, m):
    return ((n + m - 1) // m) * m


def _pick_batch_tile(B, block_b):
    """Batch tile: multiple of 8 sublanes, capped near block_b, and chosen so
    the number of tiles is even (>=2) when B > 8 so a v7x megacore can split
    the 'parallel' batch axis evenly across its two TensorCores."""
    if B <= 8:
        return 8
    n_pairs = -(-B // (2 * block_b))          # ceil(B / (2*block_b))
    tb = -(-B // (2 * n_pairs))               # ceil(B / (2*n_pairs))
    return _round_up(tb, 8)


def mlp_kernel(x_ref, w1_ref, w2_ref, o_ref):
    # Cast the activation tile to the weights' compute dtype (bf16 by default):
    # single-pass bf16 MXU matmuls with f32 accumulation.
    x = x_ref[...].astype(w1_ref.dtype)
    h = jnp.dot(x, w1_ref[...], preferred_element_type=jnp.float32)   # (tb, 128)
    h = jnp.maximum(h, 0.0)                                           # ReLU (VPU)
    o_ref[...] = jnp.dot(
        h.astype(w2_ref.dtype), w2_ref[...], preferred_element_type=jnp.float32
    ).astype(o_ref.dtype)                                             # (tb, 8)


def prepare_net_a_params(w1, w2, compute_dtype=jnp.bfloat16):
    """One-time weight prep (hoisted out of the forward path).

    w1: (128, 1712) PyTorch ip3.weight (out, in)
    w2: (2, 128)    PyTorch ip4.weight (out, in)
    returns w1_t (1712, 128), w2_t (128, 8) in `compute_dtype`.
    """
    w1_t = jnp.asarray(w1.T, dtype=compute_dtype)                      # (1712, 128)
    w2_t = jnp.zeros((HIDDEN, N_PAD), compute_dtype)
    w2_t = w2_t.at[:, :OUT_FEATURES].set(jnp.asarray(w2.T, dtype=compute_dtype))
    return w1_t, w2_t


def net_a_forward(x, w1_t, w2_t, *, block_b=1024):
    """Net_A forward.  x: (B, 1712); w1_t/w2_t from prepare_net_a_params."""
    B = x.shape[0]
    tb = _pick_batch_tile(B, block_b)
    n_tiles = pl.cdiv(B, tb)

    x_bytes = jnp.dtype(x.dtype).itemsize
    w_bytes = jnp.dtype(w1_t.dtype).itemsize

    # VMEM requirement: double-buffered x tiles + double-buffered out tiles
    # + resident weights + in-kernel temporaries (bf16 x cast, hidden acts).
    need = (2 * tb * IN_FEATURES * x_bytes
            + tb * IN_FEATURES * w_bytes
            + 2 * tb * N_PAD * 4
            + (IN_FEATURES * HIDDEN + HIDDEN * N_PAD) * w_bytes
            + tb * HIDDEN * (4 + w_bytes))
    vmem_limit = min(48 * 1024 * 1024, max(16 * 1024 * 1024, need + (4 << 20)))

    cost = pl.CostEstimate(
        flops=2 * B * IN_FEATURES * HIDDEN + 2 * B * HIDDEN * N_PAD,
        transcendentals=0,
        bytes_accessed=(B * IN_FEATURES * x_bytes
                        + (IN_FEATURES * HIDDEN + HIDDEN * N_PAD) * w_bytes
                        + B * N_PAD * 4),
    )

    out_padded = pl.pallas_call(
        mlp_kernel,
        out_shape=jax.ShapeDtypeStruct((B, N_PAD), jnp.float32),
        grid=(n_tiles,),
        in_specs=[
            # x: tiled along batch, default double-buffering overlaps DMA/compute.
            pl.BlockSpec((tb, IN_FEATURES), lambda i: (i, 0)),
            # Weights: constant block index across the grid -> single buffer.
            pl.BlockSpec((IN_FEATURES, HIDDEN), lambda i: (0, 0),
                         pipeline_mode=pl.Buffered(1)),
            pl.BlockSpec((HIDDEN, N_PAD), lambda i: (0, 0),
                         pipeline_mode=pl.Buffered(1)),
        ],
        out_specs=pl.BlockSpec((tb, N_PAD), lambda i: (i, 0)),
        compiler_params=pltpu.CompilerParams(
            # Independent batch tiles: shard across TensorCores on v7x,
            # harmless on v5e/v6e.
            dimension_semantics=("parallel",),
            vmem_limit_bytes=int(vmem_limit),
        ),
        cost_estimate=cost,
    )(x, w1_t, w2_t)

    # Drop the zero-padded logit columns (rows beyond B never exist: out_shape is (B, 8)).
    return out_padded[:, :OUT_FEATURES]


def reference_forward_f32(x, w1, w2):
    # Pure-JAX f32 reference mirroring the PyTorch module.
    h = jnp.maximum(x @ w1.T, 0.0)
    return h @ w2.T


def reference_forward_matched(x, w1, w2, compute_dtype=jnp.bfloat16):
    # Reference with the same explicit bf16-operand / f32-accumulate choice as the kernel.
    xb = x.astype(compute_dtype)
    h = jnp.dot(xb, w1.T.astype(compute_dtype), preferred_element_type=jnp.float32)
    h = jnp.maximum(h, 0.0)
    return jnp.dot(h.astype(compute_dtype), w2.T.astype(compute_dtype),
                   preferred_element_type=jnp.float32)


if __name__ == "__main__":
    key = jax.random.PRNGKey(0)
    kx, k1, k2 = jax.random.split(key, 3)

    # PyTorch-like Linear init: weight (out, in), U(-1/sqrt(fan_in), 1/sqrt(fan_in)).
    b1 = 1.0 / jnp.sqrt(IN_FEATURES)
    b2 = 1.0 / jnp.sqrt(HIDDEN)
    w1 = jax.random.uniform(k1, (HIDDEN, IN_FEATURES), jnp.float32, -b1, b1)
    w2 = jax.random.uniform(k2, (OUT_FEATURES, HIDDEN), jnp.float32, -b2, b2)

    # One-time weight prep (hoisted out of the forward path).
    w1_t, w2_t = prepare_net_a_params(w1, w2)

    # Small-shape check (batch=2, exercises the ragged sub-8-row tile).
    batch = 2
    x = jax.random.normal(kx, (batch, IN_FEATURES), jnp.float32)
    out = jax.block_until_ready(net_a_forward(x, w1_t, w2_t))
    assert out.shape == (batch, OUT_FEATURES)
    assert jnp.allclose(out, reference_forward_matched(x, w1, w2),
                        atol=1e-2, rtol=1e-2), "mismatch vs matched reference"
    assert jnp.allclose(out, reference_forward_f32(x, w1, w2),
                        atol=5e-2, rtol=5e-2), "mismatch vs f32 reference"

    # Tiled path: batch not a multiple of the tile (1000 rows -> 2 tiles of 504).
    big_b = 1000
    xb = jax.random.normal(kx, (big_b, IN_FEATURES), jnp.float32)
    out_b = jax.block_until_ready(net_a_forward(xb, w1_t, w2_t))
    assert out_b.shape == (big_b, OUT_FEATURES)
    assert jnp.allclose(out_b, reference_forward_matched(xb, w1, w2),
                        atol=1e-2, rtol=1e-2), "mismatch (tiled) vs matched reference"
    assert jnp.allclose(out_b, reference_forward_f32(xb, w1, w2),
                        atol=5e-2, rtol=5e-2), "mismatch (tiled) vs f32 reference"

    print("KERNEL_OK")
</pallas_src>

<mosaic_0001>
module attributes {stable_mosaic.version = 11 : i64} {
  func.func @mlp_kernel(%arg0: i32, %arg1: memref<8x1712xf32, #tpu.memory_space<vmem>>, %arg2: memref<1712x128xbf16, #tpu.memory_space<vmem>>, %arg3: memref<128x8xbf16, #tpu.memory_space<vmem>>, %arg4: memref<8x8xf32, #tpu.memory_space<vmem>>) attributes {dimension_semantics = [#tpu.dimension_semantics<parallel>], iteration_bounds = array<i64: 1>, scalar_prefetch = 0 : i64, scratch_operands = 0 : i64, tpu.core_type = #tpu.core_type<tc>, window_params = [{transform_indices = @transform_0, window_bounds = array<i64: 8, 1712>}, {pipeline_mode = #tpu.pipeline_mode<synchronous>, transform_indices = @transform_1, window_bounds = array<i64: 1712, 128>}, {pipeline_mode = #tpu.pipeline_mode<synchronous>, transform_indices = @transform_2, window_bounds = array<i64: 128, 8>}, {transform_indices = @transform_3, window_bounds = array<i64: 8, 8>}]} {
    %c0 = arith.constant 0 : index
    %c0_0 = arith.constant 0 : index
    %0 = vector.load %arg1[%c0, %c0_0] : memref<8x1712xf32, #tpu.memory_space<vmem>>, vector<8x1712xf32>
    %1 = arith.truncf %0 : vector<8x1712xf32> to vector<8x1712xbf16>
    %c0_1 = arith.constant 0 : index
    %c0_2 = arith.constant 0 : index
    %2 = vector.load %arg2[%c0_1, %c0_2] : memref<1712x128xbf16, #tpu.memory_space<vmem>>, vector<1712x128xbf16>
    %cst = arith.constant dense<0.000000e+00> : vector<8x128xf32>
    %3 = tpu.matmul %1, %2, %cst {dimension_numbers = #tpu.dot_dimension_numbers<[1], [0], [0], [1], [0, 0, 1, 1], [], []>} : vector<8x1712xbf16>, vector<1712x128xbf16>, vector<8x128xf32> -> vector<8x128xf32>
    %cst_3 = arith.constant 0.000000e+00 : f32
    %4 = vector.broadcast %cst_3 : f32 to vector<8x128xf32>
    %5 = arith.maximumf %3, %4 : vector<8x128xf32>
    %6 = arith.truncf %5 : vector<8x128xf32> to vector<8x128xbf16>
    %c0_4 = arith.constant 0 : index
    %c0_5 = arith.constant 0 : index
    %7 = vector.load %arg3[%c0_4, %c0_5] : memref<128x8xbf16, #tpu.memory_space<vmem>>, vector<128x8xbf16>
    %cst_6 = arith.constant dense<0.000000e+00> : vector<8x8xf32>
    %8 = tpu.matmul %6, %7, %cst_6 {dimension_numbers = #tpu.dot_dimension_numbers<[1], [0], [0], [1], [0, 0, 1, 1], [], []>} : vector<8x128xbf16>, vector<128x8xbf16>, vector<8x8xf32> -> vector<8x8xf32>
    %c0_7 = arith.constant 0 : index
    %c0_8 = arith.constant 0 : index
    %9 = vector.load %arg4[%c0_7, %c0_8] : memref<8x8xf32, #tpu.memory_space<vmem>>, vector<8x8xf32>
    tpu.vector_store %arg4[%c0_7, %c0_8], %8 {strides = array<i32>} : memref<8x8xf32, #tpu.memory_space<vmem>>, vector<8x8xf32>,
    return
  }
  func.func @transform_0(%arg0: i32) -> (i32, i32) {
    %c0_i32 = arith.constant 0 : i32
    %c0_i32_0 = arith.constant 0 : i32
    return %arg0, %c0_i32 : i32, i32
  }
  func.func @transform_1(%arg0: i32) -> (i32, i32) {
    %c0_i32 = arith.constant 0 : i32
    %c0_i32_0 = arith.constant 0 : i32
    %c0_i32_1 = arith.constant 0 : i32
    return %c0_i32, %c0_i32_0 : i32, i32
  }
  func.func @transform_2(%arg0: i32) -> (i32, i32) {
    %c0_i32 = arith.constant 0 : i32
    %c0_i32_0 = arith.constant 0 : i32
    %c0_i32_1 = arith.constant 0 : i32
    return %c0_i32, %c0_i32_0 : i32, i32
  }
  func.func @transform_3(%arg0: i32) -> (i32, i32) {
    %c0_i32 = arith.constant 0 : i32
    %c0_i32_0 = arith.constant 0 : i32
    return %arg0, %c0_i32 : i32, i32
  }
}

</mosaic_0001>

<bundles_post_ra>
// kernel: tpu_custom_call.1
= control target key start
LH: loop header
LB: loop body
LE: loop exit
PB: predicated region body
PF: predicated region fallthrough
CT: control target
= control target key end

     0   :  { %8 = vsyncpa [#allocation3], 0  ;;  %s2087_s0 = inlined_call_operand.vmem [shape: f32[2,1712], index: 0, kind: input, shape index: {}]   ;;  %s2088_s1 = inlined_call_operand.hbm [shape: bf16[1712,128], index: 1, kind: input, shape index: {}]   ;;  %s2089_s2 = inlined_call_operand.vmem [shape: bf16[128,8], index: 2, kind: input, shape index: {}]   ;;  %s2090_s3 = inlined_call_operand.hbm [shape: f32[2,8], index: 3, kind: output, shape index: {}]  }
   0x1   :  { %9 = vsyncpa [#allocation4], 0  ;;  %s1951_s12 = smov [#allocation2]   ;;  %s1903_s16 = scalar_lea.hbm %s2088_s1, 13696 }
   0x2   :  { %s17_s13 = sshll.u32 %s1951_s12, 4  ;;  %p1904_p0 = scmp.ne.s32.totalorder %s2088_s1, %s1903_s16  ;;  %s18_s13 = int_to_ptr.vmem [resolvable:$true] %s17_s13 }
   0x3   :  { %p1907_p1 = scmp.lt.u32.totalorder %s1903_s16, %s2088_s1 }
   0x5   :  { %p1909_p2 = pnand %p1907_p1, %p1904_p0 }
   0x7   :  { %1912 = shalt.err (!%p1909_p2)
}
   0x8   :  { %s1913_s21 = scalar_lea.vmem %s18_s13, 13696  ;;  %p1918_p4 = scmp.lt.s32.totalorder %s18_s13, %s18_s13 }
   0x9   :  { %p1914_p3 = scmp.ne.s32.totalorder %s18_s13, %s1913_s21  ;;  %p1919_p5 = scmp.lt.s32.totalorder %s1913_s21, %s1913_s21 }
   0xb   :  { %p1920_p6 = por %p1919_p5, %p1918_p4 }
   0xd   :  { %p1921_p7 = pnand %p1920_p6, %p1914_p3 }
   0xf   :  { %1924 = shalt.err (!%p1921_p7)
}
  0x10   :  { %s1952_s22 = smov 64   ;;  %s1953_s23 = smov 4  }
  0x11   :  { %23 = dma.hbm_to_vmem [thread:$0]  %s2088_s1, 13696, %s18_s13, [#allocation3], %s1952_s22, %s1952_s22, %s1953_s23  }
  0x12   :  { %1947 = dma.done.wait [#allocation3], 13696  }
  0x13   :  { %1948 = vsyncadd [#allocation3], 4294953600  ;;  %v1768_v0 = vld [vmem:[#allocation2 + $0x40] sm:$0xff]   ;;  %v1772_v4 = vld [vmem:[#allocation2 + $0x48] sm:$0xff]   ;;  %v1954_v24 = vmov 1983009808   ;;  %v69_v26 = vlaneseq }
  0x14   :  { %v1769_v1 = vld [vmem:[#allocation2 + $0xc0] sm:$0xff]   ;;  %1597 = vmatprep.subr.bf16.mxu0 %v1768_v0  ;;  %v1773_v5 = vld [vmem:[#allocation2 + $0xc8] sm:$0xff]   ;;  %v1776_v8 = vld [vmem:[#allocation2 + $0x50] sm:$0xff]   ;;  %v67_v25 = vunpack.c.l.s4 %v1954_v24  ;;  %vm1072_vm0 = vcmask 392192   ;;  %vm1957_vm1 = vmmov 0   ;;  %vm1462_vm2 = vcmask 64512  }
  0x15   :  { %v1770_v2 = vld [vmem:[#allocation2] sm:$0xff]   ;;  %1619 = vmatprep.subr.bf16.mxu1 %v1769_v1  ;;  %v1774_v6 = vld [vmem:[#allocation2 + $0x8] sm:$0xff]   ;;  %v1777_v9 = vld [vmem:[#allocation2 + $0xd0] sm:$0xff]   ;;  %v70_v32 = vshrl.u32 %v69_v26, 7 }
  0x16   :  { %v1771_v3 = vld [vmem:[#allocation2 + $0x80] sm:$0xff]   ;;  %1598 = vmatpush3.bf16.msra.mxu0 %v1770_v2  ;;  %v1775_v7 = vld [vmem:[#allocation2 + $0x88] sm:$0xff]   ;;  %v1778_v10 = vld [vmem:[#allocation2 + $0x10] sm:$0xff]   ;;  %v68_v31 = vunpack.c.0.s8 %v67_v25 }
  0x17   :  { %1620 = vmatpush3.bf16.msra.mxu1 %v1771_v3  ;;  %1599 = vmatprep.subr.bf16.mxu0 %v1772_v4  ;;  %v1779_v11 = vld [vmem:[#allocation2 + $0x90] sm:$0xff]   ;;  %v1780_v12 = vld [vmem:[#allocation2 + $0x58] sm:$0xff]   ;;  %v1784_v16 = vld [vmem:[#allocation2 + $0x60] sm:$0xff]  }
  0x18   :  { %1621 = vmatprep.subr.bf16.mxu1 %v1773_v5  ;;  %v1781_v13 = vld [vmem:[#allocation2 + $0xd8] sm:$0xff]   ;;  %v1785_v17 = vld [vmem:[#allocation2 + $0xe0] sm:$0xff]   ;;  %v1788_v20 = vld [vmem:[#allocation2 + $0x68] sm:$0xff]   ;;  %v1993_v37 = vsub.s32 %v68_v31, %v70_v32 }
  0x19   :  { %v1782_v14 = vld [vmem:[#allocation2 + $0x18] sm:$0xff]   ;;  %v1786_v18 = vld [vmem:[#allocation2 + $0x20] sm:$0xff]   ;;  %v1789_v21 = vld [vmem:[#allocation2 + $0xe8] sm:$0xff]  }
  0x1a   :  { %1600 = vmatpush3.bf16.msra.mxu0 %v1774_v6  ;;  %v1783_v15 = vld [vmem:[#allocation2 + $0x98] sm:$0xff]   ;;  %v1787_v19 = vld [vmem:[#allocation2 + $0xa0] sm:$0xff]   ;;  %v1790_v22 = vld [vmem:[#allocation2 + $0x28] sm:$0xff]  }
  0x1b   :  { %1622 = vmatpush3.bf16.msra.mxu1 %v1775_v7  ;;  %1601 = vmatprep.subr.bf16.mxu0 %v1776_v8  ;;  %v1791_v23 = vld [vmem:[#allocation2 + $0xa8] sm:$0xff]   ;;  %v1792_v27 = vld [vmem:[#allocation2 + $0x70] sm:$0xff]   ;;  %v1796_v33 = vld [vmem:[#allocation2 + $0x78] sm:$0xff]  }
  0x1c   :  { %1623 = vmatprep.subr.bf16.mxu1 %v1777_v9  ;;  %v1793_v28 = vld [vmem:[#allocation2 + $0xf0] sm:$0xff]   ;;  %v1797_v34 = vld [vmem:[#allocation2 + $0xf8] sm:$0xff]   ;;  %v1804_v40 = vld [vmem:[%s2087_s0 + $0x4] ss:$28 sps:$4 sm:$0xff]  }
  0x1d   :  { %v1794_v29 = vld [vmem:[#allocation2 + $0x30] sm:$0xff]   ;;  %v1798_v35 = vld [vmem:[#allocation2 + $0x38] sm:$0xff]   ;;  %v1806_v44 = vld [vmem:[#allocation2 + $0x140] sm:$0xff]   ;;  %v79_v45 = vrot.slane %v1804_v40, %v1993_v37 }
  0x1e   :  { %1602 = vmatpush3.bf16.msra.mxu0 %v1778_v10  ;;  %v1795_v30 = vld [vmem:[#allocation2 + $0xb0] sm:$0xff]   ;;  %v1799_v36 = vld [vmem:[#allocation2 + $0xb8] sm:$0xff]   ;;  %v1808_v49 = vld [vmem:[#allocation2 + $0x1c0] sm:$0xff]  }
  0x1f   :  { %1624 = vmatpush3.bf16.msra.mxu1 %v1779_v11  ;;  %1603 = vmatprep.subr.bf16.mxu0 %v1780_v12  ;;  %v1800_v38 = vld [vmem:[%s2087_s0] ss:$28 sps:$4 sm:$0xff]   ;;  %v1802_v39 = vld [vmem:[%s2087_s0 + $0x38] ss:$28 sps:$4 sm:$0xff]   ;;  %v1810_v58 = vld [vmem:[#allocation2 + $0x148] sm:$0xff]  }
  0x20   :  { %1625 = vmatprep.subr.bf16.mxu1 %v1781_v13  ;;  %v1805_v41 = vld [vmem:[%s2087_s0 + $0x3c] ss:$28 sps:$4 sm:$0xff]   ;;  %v72_v42 = vrot.slane %v1800_v38, %v1993_v37  ;;  %v86_v43 = vrot.slane %v1802_v39, %v1993_v37  ;;  %v1807_v52 = vld [vmem:[#allocation2 + $0x100] sm:$0xff]   ;;  %v1812_v59 = vld [vmem:[#allocation2 + $0x1c8] sm:$0xff]  }
  0x21   :  { %v93_v46 = vrot.slane %v1805_v41, %v1993_v37  ;;  %v1809_v55 = vld [vmem:[#allocation2 + $0x180] sm:$0xff]   ;;  %v1811_v60 = vld [vmem:[#allocation2 + $0x108] sm:$0xff]   ;;  %v1814_v62 = vld [vmem:[#allocation2 + $0x150] sm:$0xff]  }
  0x22   :  { %1604 = vmatpush3.bf16.msra.mxu0 %v1782_v14  ;;  %v95_v47 = vcombine.high %v72_v42, %v86_v43  ;;  %v94_v48 = vcombine.low %v72_v42, %v86_v43  ;;  %v1813_v61 = vld [vmem:[#allocation2 + $0x188] sm:$0xff]   ;;  %v1816_v63 = vld [vmem:[#allocation2 + $0x1d0] sm:$0xff]   ;;  %v1818_v2 = vld [vmem:[#allocation2 + $0x158] sm:$0xff]  }
  0x23   :  { %1626 = vmatpush3.bf16.msra.mxu1 %v1783_v15  ;;  %1605 = vmatprep.subr.bf16.mxu0 %v1784_v16  ;;  %v97_v50 = vcombine.high %v79_v45, %v93_v46  ;;  %v96_v51 = vcombine.low %v79_v45, %v93_v46  ;;  %v1815_v0 = vld [vmem:[#allocation2 + $0x110] sm:$0xff]   ;;  %v1820_v3 = vld [vmem:[#allocation2 + $0x1d8] sm:$0xff]   ;;  %v1822_v6 = vld [vmem:[#allocation2 + $0x160] sm:$0xff]  }
  0x24   :  { %1627 = vmatprep.subr.bf16.mxu1 %v1785_v17  ;;  %v203_v53 = vpack.c.bf16 %v95_v47, %v95_v47  ;;  %v202_v54 = vpack.c.bf16 %v94_v48, %v94_v48  ;;  %v1817_v1 = vld [vmem:[#allocation2 + $0x190] sm:$0xff]   ;;  %v1819_v4 = vld [vmem:[#allocation2 + $0x118] sm:$0xff]   ;;  %v1824_v7 = vld [vmem:[#allocation2 + $0x1e0] sm:$0xff]  }
  0x25   :  { %v205_v56 = vpack.c.bf16 %v97_v50, %v97_v50  ;;  %v204_v57 = vpack.c.bf16 %v96_v51, %v96_v51  ;;  %v1821_v5 = vld [vmem:[#allocation2 + $0x198] sm:$0xff]   ;;  %v1823_v8 = vld [vmem:[#allocation2 + $0x120] sm:$0xff]   ;;  %v1826_v10 = vld [vmem:[#allocation2 + $0x168] sm:$0xff]  }
  0x26   :  { %1606 = vmatpush3.bf16.msra.mxu0 %v1786_v18  ;;  %1108 = vmatprep.mubr.bf16.mxu0 %v203_v53  ;;  %v1825_v9 = vld [vmem:[#allocation2 + $0x1a0] sm:$0xff]   ;;  %v1828_v11 = vld [vmem:[#allocation2 + $0x1e8] sm:$0xff]   ;;  %v1830_v14 = vld [vmem:[#allocation2 + $0x170] sm:$0xff]  }
  0x27   :  { %1628 = vmatpush3.bf16.msra.mxu1 %v1787_v19  ;;  %1607 = vmatprep.subr.bf16.mxu0 %v1788_v20  ;;  %v1827_v12 = vld [vmem:[#allocation2 + $0x128] sm:$0xff]   ;;  %v1832_v15 = vld [vmem:[#allocation2 + $0x1f0] sm:$0xff]   ;;  %v1834_v18 = vld [vmem:[#allocation2 + $0x178] sm:$0xff]  }
  0x28   :  { %1629 = vmatprep.subr.bf16.mxu1 %v1789_v21  ;;  %1148 = vmatprep.mubr.bf16.mxu1 %v205_v56  ;;  %v1829_v13 = vld [vmem:[#allocation2 + $0x1a8] sm:$0xff]   ;;  %v1831_v16 = vld [vmem:[#allocation2 + $0x130] sm:$0xff]   ;;  %v1835_v19 = vld [vmem:[#allocation2 + $0x138] sm:$0xff]  }
  0x29   :  { %v1833_v17 = vld [vmem:[#allocation2 + $0x1b0] sm:$0xff]   ;;  %v1836_v20 = vld [vmem:[#allocation2 + $0x1f8] sm:$0xff]   ;;  %v1837_v21 = vld [vmem:[%s2087_s0 + $0x8] ss:$28 sps:$4 sm:$0xff]  }
  0x2a   :  { %1608 = vmatpush3.bf16.msra.mxu0 %v1790_v22  ;;  %v1839_v22 = vld [vmem:[%s2087_s0 + $0x40] ss:$28 sps:$4 sm:$0xff]   ;;  %v108_v24 = vrot.slane %v1837_v21, %v1993_v37  ;;  %v1848_v40 = vld [vmem:[#allocation2 + $0x248] sm:$0xff]   ;;  %v1852_v46 = vld [vmem:[#allocation2 + $0x250] sm:$0xff]  }
  0x2b   :  { %1630 = vmatpush3.bf16.msra.mxu1 %v1791_v23  ;;  %1609 = vmatprep.subr.bf16.mxu0 %v1792_v27  ;;  %v1841_v23 = vld [vmem:[#allocation2 + $0x1b8] sm:$0xff]   ;;  %v122_v25 = vrot.slane %v1839_v22, %v1993_v37  ;;  %v1842_v26 = vld [vmem:[#allocation2 + $0x240] sm:$0xff]   ;;  %v1843_v27 = vld [vmem:[%s2087_s0 + $0xc] ss:$28 sps:$4 sm:$0xff]  }
  0x2c   :  { %1631 = vmatprep.subr.bf16.mxu1 %v1793_v28  ;;  %v1844_v28 = vld [vmem:[%s2087_s0 + $0x44] ss:$28 sps:$4 sm:$0xff]   ;;  %v115_v31 = vrot.slane %v1843_v27, %v1993_v37  ;;  %v1850_v45 = vld [vmem:[#allocation2 + $0x2c8] sm:$0xff]   ;;  %v1853_v48 = vld [vmem:[#allocation2 + $0x210] sm:$0xff]  }
  0x2d   :  { %v129_v32 = vrot.slane %v1844_v28, %v1993_v37  ;;  %v1847_v41 = vld [vmem:[#allocation2 + $0x280] sm:$0xff]   ;;  %v1851_v47 = vld [vmem:[#allocation2 + $0x288] sm:$0xff]   ;;  %v1856_v50 = vld [vmem:[#allocation2 + $0x258] sm:$0xff]  }
  0x2e   :  { %1610 = vmatpush3.bf16.msra.mxu0 %v1794_v29  ;;  %v131_v29 = vcombine.high %v108_v24, %v122_v25  ;;  %v1855_v51 = vld [vmem:[#allocation2 + $0x290] sm:$0xff]   ;;  %v1858_v53 = vld [vmem:[#allocation2 + $0x2d8] sm:$0xff]   ;;  %v1861_v56 = vld [vmem:[#allocation2 + $0x220] sm:$0xff]  }
  0x2f   :  { %1632 = vmatpush3.bf16.msra.mxu1 %v1795_v30  ;;  %1611 = vmatprep.subr.bf16.mxu0 %v1796_v33  ;;  %v130_v30 = vcombine.low %v108_v24, %v122_v25  ;;  %v1846_v33 = vld [vmem:[#allocation2 + $0x2c0] sm:$0xff]   ;;  %v133_v38 = vcombine.high %v115_v31, %v129_v32  ;;  %v132_v39 = vcombine.low %v115_v31, %v129_v32  ;;  %v1883_v25 = vld [vmem:[#allocation2 + $0x308] sm:$0xff]   ;;  %v1893_v27 = vld [vmem:[%s2087_s0 + $0x18] ss:$28 sps:$4 sm:$0xff]  }
  0x30   :  { %1633 = vmatprep.subr.bf16.mxu1 %v1797_v34  ;;  %v207_v34 = vpack.c.bf16 %v131_v29, %v131_v29  ;;  %v1882_v22 = vld [vmem:[#allocation2 + $0x300] sm:$0xff]   ;;  %v1894_v28 = vld [vmem:[%s2087_s0 + $0x50] ss:$28 sps:$4 sm:$0xff]   ;;  %v1885_v29 = vld [vmem:[#allocation2 + $0x318] sm:$0xff]  }
  0x31   :  { %v209_v42 = vpack.c.bf16 %v133_v38, %v133_v38  ;;  %v208_v43 = vpack.c.bf16 %v132_v39, %v132_v39  ;;  %v185_v31 = vrot.slane %v1894_v28, %v1993_v37  ;;  %v1889_v38 = vld [vmem:[#allocation2 + $0x338] sm:$0xff]   ;;  %v1890_v39 = vld [vmem:[#allocation2 + $0x340] sm:$0xff]  }
  0x32   :  { %1612 = vmatpush3.bf16.msra.mxu0 %v1798_v35  ;;  %v206_v35 = vpack.c.bf16 %v130_v30, %v130_v30  ;;  %v178_v30 = vrot.slane %v1893_v27, %v1993_v37 }
  0x33   :  { %1634 = vmatpush3.bf16.msra.mxu1 %v1799_v36  ;;  %1641 = vmatprep.subr.bf16.mxu0 %v1806_v44  ;;  %v1845_v36 = vld [vmem:[#allocation2 + $0x200] sm:$0xff]   ;;  %v1849_v44 = vld [vmem:[#allocation2 + $0x208] sm:$0xff]  }
  0x34   :  { %1663 = vmatprep.subr.bf16.mxu1 %v1808_v49  ;;  %v1854_v49 = vld [vmem:[#allocation2 + $0x2d0] sm:$0xff]   ;;  %v187_v32 = vcombine.high %v178_v30, %v185_v31 }
  0x35   :  { %1109 = vmatmul.mubr.bf16.vlgmr.msra.gmra.mrb[0].mxu0 %v202_v54  ;;  %v1860_v54 = vld [vmem:[#allocation2 + $0x260] sm:$0xff]  }
  0x36   :  { %1149 = vmatmul.mubr.bf16.vlgmr.msra.gmra.mrb[0].mxu1 %v204_v57  ;;  %1642 = vmatpush3.bf16.msra.mxu0 %v1807_v52  ;;  %v1857_v52 = vld [vmem:[#allocation2 + $0x218] sm:$0xff]   ;;  %v1862_v57 = vld [vmem:[#allocation2 + $0x2e0] sm:$0xff]  }
  0x37   :  { %1664 = vmatpush3.bf16.msra.mxu1 %v1809_v55  ;;  %1643 = vmatprep.subr.bf16.mxu0 %v1810_v58  ;;  %v1859_v55 = vld [vmem:[#allocation2 + $0x298] sm:$0xff]   ;;  %v1864_v58 = vld [vmem:[#allocation2 + $0x268] sm:$0xff]  }
  0x38   :  { %1665 = vmatprep.subr.bf16.mxu1 %v1812_v59  ;;  %1188 = vmatprep.mubr.bf16.mxu0 %v207_v34  ;;  %v1863_v59 = vld [vmem:[#allocation2 + $0x2a0] sm:$0xff]  }
  0x39   :  { %1228 = vmatprep.mubr.bf16.mxu1 %v209_v42  ;;  %v1886_v34 = vld [vmem:[#allocation2 + $0x320] sm:$0xff]  }
  0x3a   :  { %1644 = vmatpush3.bf16.msra.mxu0 %v1811_v60  ;;  %v1865_v60 = vld [vmem:[#allocation2 + $0x228] sm:$0xff]  }
  0x3b   :  { %1666 = vmatpush3.bf16.msra.mxu1 %v1813_v61  ;;  %1645 = vmatprep.subr.bf16.mxu0 %v1814_v62  ;;  %v1866_v61 = vld [vmem:[#allocation2 + $0x2e8] sm:$0xff]   ;;  %v1868_v62 = vld [vmem:[#allocation2 + $0x270] sm:$0xff]  }
  0x3c   :  { %1667 = vmatprep.subr.bf16.mxu1 %v1816_v63  ;;  %v1867_v63 = vld [vmem:[#allocation2 + $0x2a8] sm:$0xff]  }
  0x3e   :  { %1646 = vmatpush3.bf16.msra.mxu0 %v1815_v0  ;;  %v1869_v0 = vld [vmem:[#allocation2 + $0x230] sm:$0xff]  }
  0x3f   :  { %1668 = vmatpush3.bf16.msra.mxu1 %v1817_v1  ;;  %1647 = vmatprep.subr.bf16.mxu0 %v1818_v2  ;;  %v1870_v1 = vld [vmem:[#allocation2 + $0x2f0] sm:$0xff]  }
  0x40   :  { %1669 = vmatprep.subr.bf16.mxu1 %v1820_v3  ;;  %v1871_v2 = vld [vmem:[#allocation2 + $0x2b0] sm:$0xff]   ;;  %v1872_v3 = vld [vmem:[#allocation2 + $0x278] sm:$0xff]  }
  0x42   :  { %1648 = vmatpush3.bf16.msra.mxu0 %v1819_v4  ;;  %v1873_v4 = vld [vmem:[#allocation2 + $0x238] sm:$0xff]  }
  0x43   :  { %1670 = vmatpush3.bf16.msra.mxu1 %v1821_v5  ;;  %1649 = vmatprep.subr.bf16.mxu0 %v1822_v6  ;;  %v1874_v5 = vld [vmem:[#allocation2 + $0x2f8] sm:$0xff]   ;;  %v1875_v6 = vld [vmem:[%s2087_s0 + $0x10] ss:$28 sps:$4 sm:$0xff]  }
  0x44   :  { %1671 = vmatprep.subr.bf16.mxu1 %v1824_v7  ;;  %v1877_v7 = vld [vmem:[%s2087_s0 + $0x48] ss:$28 sps:$4 sm:$0xff]  }
  0x46   :  { %1650 = vmatpush3.bf16.msra.mxu0 %v1823_v8  ;;  %v144_v8 = vrot.slane %v1875_v6, %v1993_v37 }
  0x47   :  { %1672 = vmatpush3.bf16.msra.mxu1 %v1825_v9  ;;  %1651 = vmatprep.subr.bf16.mxu0 %v1826_v10  ;;  %v1880_v9 = vld [vmem:[%s2087_s0 + $0x14] ss:$28 sps:$4 sm:$0xff]   ;;  %v1881_v10 = vld [vmem:[%s2087_s0 + $0x4c] ss:$28 sps:$4 sm:$0xff]  }
  0x48   :  { %1673 = vmatprep.subr.bf16.mxu1 %v1828_v11  ;;  %v158_v11 = vrot.slane %v1877_v7, %v1993_v37 }
  0x4a   :  { %1652 = vmatpush3.bf16.msra.mxu0 %v1827_v12  ;;  %v1879_v12 = vld [vmem:[#allocation2 + $0x2b8] sm:$0xff]  }
  0x4b   :  { %1674 = vmatpush3.bf16.msra.mxu1 %v1829_v13  ;;  %1653 = vmatprep.subr.bf16.mxu0 %v1830_v14  ;;  %v151_v13 = vrot.slane %v1880_v9, %v1993_v37  ;;  %v165_v14 = vrot.slane %v1881_v10, %v1993_v37  ;;  %v1891_v37 = vld [vmem:[#allocation2 + $0x348] sm:$0xff]  }
  0x4c   :  { %1675 = vmatprep.subr.bf16.mxu1 %v1832_v15  ;;  %v167_v15 = vcombine.high %v144_v8, %v158_v11 }
  0x4e   :  { %1654 = vmatpush3.bf16.msra.mxu0 %v1831_v16  ;;  %v166_v16 = vcombine.low %v144_v8, %v158_v11 }
  0x4f   :  { %1676 = vmatpush3.bf16.msra.mxu1 %v1833_v17  ;;  %1655 = vmatprep.subr.bf16.mxu0 %v1834_v18  ;;  %v1955_v17 = vmov 0   ;;  %v169_v18 = vcombine.high %v151_v13, %v165_v14 }
  0x50   :  { %1677 = vmatprep.subr.bf16.mxu1 %v1836_v20  ;;  %v211_v20 = vpack.c.bf16 %v167_v15, %v167_v15  ;;  %v210_v21 = vpack.c.bf16 %v166_v16, %v166_v16 }
  0x52   :  { %1656 = vmatpush3.bf16.msra.mxu0 %v1835_v19  ;;  %v168_v19 = vcombine.low %v151_v13, %v165_v14 }
  0x53   :  { %1678 = vmatpush3.bf16.msra.mxu1 %v1841_v23  ;;  %1685 = vmatprep.subr.bf16.mxu0 %v1842_v26  ;;  %v213_v23 = vpack.c.bf16 %v169_v18, %v169_v18  ;;  %v1884_v26 = vld [vmem:[#allocation2 + $0x310] sm:$0xff]  }
  0x54   :  { %1707 = vmatprep.subr.bf16.mxu1 %v1846_v33  ;;  %v212_v24 = vpack.c.bf16 %v168_v19, %v168_v19  ;;  %v215_v33 = vpack.c.bf16 %v187_v32, %v187_v32 }
  0x55   :  { %1189 = vmatmul.mubr.bf16.vlgmr.msra.gmra.mrb[4].mxu0 %v206_v35  ;;  %v1887_v35 = vld [vmem:[#allocation2 + $0x328] sm:$0xff]  }
  0x56   :  { %1686 = vmatpush3.bf16.msra.mxu0 %v1845_v36  ;;  %1229 = vmatmul.mubr.bf16.vlgmr.msra.gmra.mrb[4].mxu1 %v208_v43  ;;  %v1888_v36 = vld [vmem:[#allocation2 + $0x330] sm:$0xff]   ;;  %v1895_v43 = vld [vmem:[%s2089_s2] sm:$0xff]  }
  0x57   :  { %1687 = vmatprep.subr.bf16.mxu0 %v1848_v40  ;;  %1708 = vmatpush3.bf16.msra.mxu1 %v1847_v41  ;;  %v186_v40 = vcombine.low %v178_v30, %v185_v31  ;;  %v1892_v41 = vld [vmem:[#allocation2 + $0x350] sm:$0xff]  }
  0x58   :  { %1709 = vmatprep.subr.bf16.mxu1 %v1850_v45  ;;  %1268 = vmatprep.mubr.bf16.mxu0 %v211_v20  ;;  %v1896_v45 = vld [vmem:[%s2089_s2 + $0x8] sm:$0xff]  }
  0x59   :  { %1308 = vmatprep.mubr.bf16.mxu1 %v213_v23  ;;  %v214_v42 = vpack.c.bf16 %v186_v40, %v186_v40 }
  0x5a   :  { %1688 = vmatpush3.bf16.msra.mxu0 %v1849_v44  ;;  %v1956_v44 = vmov 0.0  }
  0x5b   :  { %1689 = vmatprep.subr.bf16.mxu0 %v1852_v46  ;;  %1710 = vmatpush3.bf16.msra.mxu1 %v1851_v47  ;;  %v1897_v46 = vld [vmem:[%s2089_s2 + $0x10] sm:$0xff]   ;;  %v1898_v47 = vld [vmem:[%s2089_s2 + $0x18] sm:$0xff]  }
  0x5c   :  { %1711 = vmatprep.subr.bf16.mxu1 %v1854_v49  ;;  %v1900_v49 = vld [vmem:[%s2089_s2 + $0x28] sm:$0xff]  }
  0x5e   :  { %1690 = vmatpush3.bf16.msra.mxu0 %v1853_v48  ;;  %v1899_v48 = vld [vmem:[%s2089_s2 + $0x20] sm:$0xff]  }
  0x5f   :  { %1691 = vmatprep.subr.bf16.mxu0 %v1856_v50  ;;  %1712 = vmatpush3.bf16.msra.mxu1 %v1855_v51  ;;  %v1901_v50 = vld [vmem:[%s2089_s2 + $0x30] sm:$0xff]   ;;  %v1902_v51 = vld [vmem:[%s2089_s2 + $0x38] sm:$0xff]  }
  0x60   :  { %1713 = vmatprep.subr.bf16.mxu1 %v1858_v53 }
  0x62   :  { %1692 = vmatpush3.bf16.msra.mxu0 %v1857_v52 }
  0x63   :  { %1693 = vmatprep.subr.bf16.mxu0 %v1860_v54  ;;  %1714 = vmatpush3.bf16.msra.mxu1 %v1859_v55 }
  0x64   :  { %1715 = vmatprep.subr.bf16.mxu1 %v1862_v57 }
  0x66   :  { %1694 = vmatpush3.bf16.msra.mxu0 %v1861_v56 }
  0x67   :  { %1695 = vmatprep.subr.bf16.mxu0 %v1864_v58  ;;  %1716 = vmatpush3.bf16.msra.mxu1 %v1863_v59 }
  0x68   :  { %1717 = vmatprep.subr.bf16.mxu1 %v1866_v61 }
  0x6a   :  { %1696 = vmatpush3.bf16.msra.mxu0 %v1865_v60 }
  0x6b   :  { %1697 = vmatprep.subr.bf16.mxu0 %v1868_v62  ;;  %1718 = vmatpush3.bf16.msra.mxu1 %v1867_v63 }
  0x6c   :  { %1719 = vmatprep.subr.bf16.mxu1 %v1870_v1 }
  0x6e   :  { %1698 = vmatpush3.bf16.msra.mxu0 %v1869_v0 }
  0x6f   :  { %1699 = vmatprep.subr.bf16.mxu0 %v1872_v3  ;;  %1720 = vmatpush3.bf16.msra.mxu1 %v1871_v2 }
  0x70   :  { %1721 = vmatprep.subr.bf16.mxu1 %v1874_v5 }
  0x72   :  { %1700 = vmatpush3.bf16.msra.mxu0 %v1873_v4 }
  0x73   :  { %1316 = vmatprep.subr.bf16.mxu0 %v1955_v17  ;;  %1722 = vmatpush3.bf16.msra.mxu1 %v1879_v12 }
  0x74   :  { %1738 = vmatprep.subr.bf16.mxu1 %v1956_v44 }
  0x75   :  { %1269 = vmatmul.mubr.bf16.vlgmr.msra.gmra.mrb[8].mxu0 %v210_v21 }
  0x76   :  { %1317 = vmatpush1.bf16.msra.mxu0 %v1882_v22  ;;  %1309 = vmatmul.mubr.bf16.vlgmr.msra.gmra.mrb[8].mxu1 %v212_v24 }
  0x77   :  { %1318 = vmatprep.subr.bf16.mxu0 %v1955_v17  ;;  %1588 = vmatprep.mubr.msk.bf16.mxu0 %vm1072_vm0, %v215_v33 }
  0x78   :  { %1739 = vmatpush3.bf16.msra.mxu1 %v1895_v43  ;;  %1754 = vmatprep.mubr.msk.bf16.mxu1 %vm1957_vm1, %v1956_v44 }
  0x79   :  { %1740 = vmatprep.subr.bf16.mxu1 %v1956_v44 }
  0x7a   :  { %1319 = vmatpush1.bf16.msra.mxu0 %v1883_v25 }
  0x7b   :  { %1320 = vmatprep.subr.bf16.mxu0 %v1955_v17 }
  0x7c   :  { %1741 = vmatpush3.bf16.msra.mxu1 %v1896_v45 }
  0x7d   :  { %1742 = vmatprep.subr.bf16.mxu1 %v1956_v44 }
  0x7e   :  { %1321 = vmatpush1.bf16.msra.mxu0 %v1884_v26 }
  0x7f   :  { %1322 = vmatprep.subr.bf16.mxu0 %v1955_v17 }
  0x80   :  { %1743 = vmatpush3.bf16.msra.mxu1 %v1897_v46 }
  0x81   :  { %1744 = vmatprep.subr.bf16.mxu1 %v1956_v44 }
  0x82   :  { %1323 = vmatpush1.bf16.msra.mxu0 %v1885_v29 }
  0x83   :  { %1324 = vmatprep.subr.bf16.mxu0 %v1955_v17 }
  0x84   :  { %1745 = vmatpush3.bf16.msra.mxu1 %v1898_v47 }
  0x85   :  { %1746 = vmatprep.subr.bf16.mxu1 %v1956_v44 }
  0x86   :  { %1325 = vmatpush1.bf16.msra.mxu0 %v1886_v34 }
  0x87   :  { %1326 = vmatprep.subr.bf16.mxu0 %v1955_v17 }
  0x88   :  { %1747 = vmatpush3.bf16.msra.mxu1 %v1899_v48 }
  0x89   :  { %1748 = vmatprep.subr.bf16.mxu1 %v1956_v44 }
  0x8a   :  { %1327 = vmatpush1.bf16.msra.mxu0 %v1887_v35 }
  0x8b   :  { %1328 = vmatprep.subr.bf16.mxu0 %v1955_v17 }
  0x8c   :  { %1749 = vmatpush3.bf16.msra.mxu1 %v1900_v49 }
  0x8d   :  { %1750 = vmatprep.subr.bf16.mxu1 %v1956_v44 }
  0x8e   :  { %1329 = vmatpush1.bf16.msra.mxu0 %v1888_v36 }
  0x8f   :  { %1330 = vmatprep.subr.bf16.mxu0 %v1955_v17 }
  0x90   :  { %1751 = vmatpush3.bf16.msra.mxu1 %v1901_v50 }
  0x91   :  { %1752 = vmatprep.subr.bf16.mxu1 %v1956_v44 }
  0x92   :  { %1331 = vmatpush1.bf16.msra.mxu0 %v1889_v38 }
  0x93   :  { %1332 = vmatprep.subr.bf16.mxu0 %v1955_v17 }
  0x94   :  { %1753 = vmatpush3.bf16.msra.mxu1 %v1902_v51 }
  0x96   :  { %1333 = vmatpush1.bf16.msra.mxu0 %v1890_v39 }
  0x97   :  { %1334 = vmatprep.subr.bf16.mxu0 %v1955_v17 }
  0x9a   :  { %1335 = vmatpush1.bf16.msra.mxu0 %v1891_v37 }
  0x9b   :  { %1336 = vmatprep.subr.bf16.mxu0 %v1955_v17 }
  0x9e   :  { %1337 = vmatpush1.bf16.msra.mxu0 %v1892_v41 }
  0xa1   :  { %1349 = vmatmul.mubr.bf16.vlgmr.msra.gmra.mrb[12].mxu0 %v214_v42 }
 0x108   :  { %v1613_v52 = vpop.f32.mrb[0].mxu0 }
 0x109   :  { %v1635_v53 = vpop.f32.mrb[0].mxu1  ;;  %v1614_v54 = vpop.f32.mrb[1].mxu0 }
 0x10a   :  { %v1615_v55 = vadd.f32 %v1614_v54, %v1613_v52  ;;  %v1636_v56 = vpop.f32.mrb[1].mxu1  ;;  %v1616_v57 = vpop.f32.mrb[2].mxu0 }
 0x10b   :  { %v1637_v58 = vadd.f32 %v1636_v56, %v1635_v53  ;;  %v1617_v59 = vpop.f32.mrb[3].mxu0  ;;  %v1638_v60 = vpop.f32.mrb[2].mxu1 }
 0x10c   :  { %v1639_v61 = vpop.f32.mrb[3].mxu1 }
 0x10d   :  { %v1151_v62 = vadd.f32 %v1637_v58, %v1615_v55 }
 0x128   :  { %v1657_v63 = vpop.f32.mrb[4].mxu0 }
 0x129   :  { %v1658_v0 = vpop.f32.mrb[5].mxu0  ;;  %v1679_v3 = vpop.f32.mrb[4].mxu1 }
 0x12a   :  { %v1659_v1 = vadd.f32 %v1658_v0, %v1657_v63  ;;  %v1660_v2 = vpop.f32.mrb[6].mxu0  ;;  %v1680_v6 = vpop.f32.mrb[5].mxu1 }
 0x12b   :  { %v1661_v4 = vpop.f32.mrb[7].mxu0  ;;  %v1681_v7 = vadd.f32 %v1680_v6, %v1679_v3  ;;  %v1682_v8 = vpop.f32.mrb[6].mxu1 }
 0x12c   :  { %v1191_v5 = vadd.f32 %v1659_v1, %v1151_v62  ;;  %v1683_v9 = vpop.f32.mrb[7].mxu1 }
 0x12e   :  { %v1231_v10 = vadd.f32 %v1681_v7, %v1191_v5 }
 0x148   :  { %v1701_v11 = vpop.f32.mrb[8].mxu0 }
 0x149   :  { %v1702_v12 = vpop.f32.mrb[9].mxu0  ;;  %v1723_v13 = vpop.f32.mrb[8].mxu1 }
 0x14a   :  { %v1703_v14 = vadd.f32 %v1702_v12, %v1701_v11  ;;  %v1704_v15 = vpop.f32.mrb[10].mxu0  ;;  %v1724_v16 = vpop.f32.mrb[9].mxu1 }
 0x14b   :  { %v1705_v17 = vpop.f32.mrb[11].mxu0  ;;  %v1725_v18 = vadd.f32 %v1724_v16, %v1723_v13  ;;  %v1726_v19 = vpop.f32.mrb[10].mxu1 }
 0x14c   :  { %v1271_v20 = vadd.f32 %v1703_v14, %v1231_v10  ;;  %v1727_v21 = vpop.f32.mrb[11].mxu1 }
 0x14e   :  { %v1311_v22 = vadd.f32 %v1725_v18, %v1271_v20 }
 0x174   :  { %v1350_v23 = vpop.f32.mrb[12].mxu0 }
 0x175   :  { %v1351_v24 = vadd.f32 %v1350_v23, %v1311_v22  ;;  %v1352_v25 = vpop.f32.mrb[13].mxu0 }
 0x176   :  { %v1353_v26 = vpop.f32.mrb[14].mxu0 }
 0x177   :  { %v1356_v27 = vmax.f32 %v1351_v24, 0.0  ;;  %v1354_v28 = vpop.f32.mrb[15].mxu0 }
 0x179   :  { %v1357_v29 = vpack.c.bf16 %v1356_v27, %v1356_v27 }
 0x17b   :  { %1755 = vmatmul.mubr.bf16.vlgmr.msra.gmra.mrb[12].mxu1 %v1357_v29 }
 0x24e   :  { %v1456_v30 = vpop.f32.mrb[12].mxu1 }
 0x24f   :  { %1463 = vst.msk [vmem:[#allocation5] sm:$0xff] %vm1462_vm2, %v1456_v30  ;;  %v1756_v31 = vpop.f32.mrb[13].mxu1 }
 0x250   :  { %v1459_v32 = vpop.f32.mrb[14].mxu1 }
 0x251   :  { %v1757_v33 = vpop.f32.mrb[15].mxu1 }
 0x252   :  { %1468 = vsyncadd [#allocation4], 96  ;;  %s1958_s2 = smov [#allocation5]  }
 0x253   :  { %s1469_s13 = sshll.u32 %s1958_s2, 4  ;;  %s1470_s13 = int_to_ptr.vmem [resolvable:$true] %s1469_s13 }
 0x254   :  { %s1925_s14 = scalar_lea.vmem %s1470_s13, 32  ;;  %s1929_s15 = scalar_lea.vmem %s1470_s13, 128 }
 0x255   :  { %p1926_p8 = scmp.ne.s32.totalorder %s1470_s13, %s1925_s14  ;;  %p1930_p9 = scmp.lt.s32.totalorder %s1470_s13, %s1470_s13 }
 0x256   :  { %p1931_p10 = scmp.lt.s32.totalorder %s1929_s15, %s1925_s14 }
 0x258   :  { %p1932_p11 = por %p1931_p10, %p1930_p9 }
 0x25a   :  { %p1933_p12 = pnand %p1932_p11, %p1926_p8 }
 0x25c   :  { %1936 = shalt.err (!%p1933_p12)
}
 0x25d   :  { %s1937_s18 = scalar_lea.hbm %s2090_s3, 32 }
 0x25e   :  { %p1938_p13 = scmp.ne.s32.totalorder %s2090_s3, %s1937_s18  ;;  %p1941_p0 = scmp.lt.u32.totalorder %s1937_s18, %s2090_s3 }
 0x260   :  { %p1943_p1 = pnand %p1941_p0, %p1938_p13 }
 0x262   :  { %1946 = shalt.err (!%p1943_p1)
}
 0x263   :  { %s1959_s23 = smov 32   ;;  %s1960_s24 = smov 2  }
 0x264   :  { %1475 = dma.vmem_to_hbm [thread:$0]  %s1470_s13, 32, %s2090_s3, [#allocation4], %s1959_s23, %s1959_s23, %s1960_s24  }
 0x265   :  { %1949 = dma.done.wait [#allocation4], 128  }
 0x266   :  { %1950 = vsyncadd [#allocation4], 4294967168 }
 0x267   :  { %1479 = vsyncpa [#allocation3], 1 }
 0x268   :  { %1480 = vsyncpa [#allocation4], 1 }

</bundles_post_ra>
